<compile_context>
chip_gen: v5e
topology: v5e:2x2
jax: 0.10.0
libtpu: 0.0.40
codegen_flags: <defaults>
</compile_context>

<pallas_src>
import math
from functools import partial

import numpy as np
import jax
import jax.numpy as jnp
from jax.experimental import pallas as pl
from jax.experimental.pallas import tpu as pltpu


# ----------------------------------------------------------------------------
# Pallas kernel: (TM, K) x (K, N) GEMM with resident weight/bias and fused
# bias + optional PReLU epilogue.  Grid is 1-D over M; W/bias never re-DMA.
# ----------------------------------------------------------------------------
def _gemm_bias_act_kernel(a_ref, w_ref, b_ref, o_ref, *, alpha):
    acc = jnp.dot(a_ref[...], w_ref[...], preferred_element_type=jnp.float32)
    acc = acc + b_ref[...]                       # f32 epilogue (v5e-friendly)
    if alpha is not None:
        acc = jnp.where(acc >= 0.0, acc, alpha * acc)
    o_ref[...] = acc.astype(o_ref.dtype)


def _round_up(x, m):
    return (x + m - 1) // m * m


_VMEM_BUDGET = 40 * 1024 * 1024      # double-buffered working-set target (v7x-safe)
_OUT_DTYPE = jnp.bfloat16            # bf16 activations end-to-end


def _pick_tm(M, Kp, Np, out_bytes):
    """Rows per grid step.  Big tiles amortize per-step overhead; the budget
    keeps resident W + double-buffered A/out under ~40 MiB so the same tiling
    is safe on v7x (64 MiB/TC) as well as v5e/v6e (128 MiB)."""
    w_bytes = 2 * Kp * Np * 2 + 2 * Np * 4             # W + bias (2 buffers)
    per_row = 2 * Kp * 2 + 2 * Np * out_bytes          # A + out (2 buffers)
    cap = max((_VMEM_BUDGET - w_bytes) // per_row, 128)
    if M <= min(cap, 512):
        return _round_up(max(M, 16), 16)               # single M block (bf16 pack)
    best, best_waste = 256, None
    for tm in (1024, 768, 512, 256):                   # 256-aligned for 256x256 MXU
        if tm > cap:
            continue
        waste = _round_up(M, tm) - M
        if best_waste is None or waste < best_waste:
            best, best_waste = tm, waste
    return best


@partial(jax.jit, static_argnames=("n_out", "alpha"))
def gemm_bias_act(a, wp, bp, *, n_out, alpha):
    """a: (M, K) float.  wp: (Kp, Np) bf16 pre-packed (zero-padded K/N).
    bp: (1, Np) f32.  Returns (M, n_out) bf16 of prelu(a @ w + b)
    (affine result if alpha is None)."""
    M, K = a.shape
    Kp, Np = wp.shape
    out_bytes = jnp.dtype(_OUT_DTYPE).itemsize
    TM = _pick_tm(M, Kp, Np, out_bytes)
    Mp = _round_up(M, TM)

    a = a.astype(jnp.bfloat16)
    if Mp != M or Kp != K:
        # Padded K columns of A hit zero rows of W; padded M rows are sliced off.
        a = jnp.pad(a, ((0, Mp - M), (0, Kp - K)))

    vmem = (2 * Kp * Np * 2 + 2 * Np * 4
            + 2 * TM * Kp * 2 + 2 * TM * Np * out_bytes
            + (6 << 20))                                # headroom for f32 temps

    out = pl.pallas_call(
        partial(_gemm_bias_act_kernel, alpha=alpha),
        out_shape=jax.ShapeDtypeStruct((Mp, Np), _OUT_DTYPE),
        grid_spec=pltpu.PrefetchScalarGridSpec(
            num_scalar_prefetch=0,
            grid=(Mp // TM,),
            in_specs=[
                pl.BlockSpec((TM, Kp), lambda i: (i, 0)),   # A streams over M
                pl.BlockSpec((Kp, Np), lambda i: (0, 0)),   # W resident
                pl.BlockSpec((1, Np), lambda i: (0, 0)),    # bias resident
            ],
            out_specs=pl.BlockSpec((TM, Np), lambda i: (i, 0)),
        ),
        compiler_params=pltpu.CompilerParams(
            dimension_semantics=("parallel",),
            vmem_limit_bytes=int(min(vmem, 48 * 1024 * 1024)),
        ),
    )(a, wp, bp)

    if Mp != M or Np != n_out:
        out = out[:M, :n_out]
    return out


# ----------------------------------------------------------------------------
# im2col glue (NHWC, bf16) around the Pallas GEMM
# ----------------------------------------------------------------------------
def _im2col(x, KH, KW, stride):
    """x: (N, H, W, C) already padded.  Returns ((N*OH*OW, KH*KW*C), OH, OW).
    Row flattening order is (kh, kw, c) to match the packed weights."""
    N, H, W, C = x.shape
    OH = (H - KH) // stride + 1
    OW = (W - KW) // stride + 1
    ih = (jnp.arange(OH) * stride)[:, None] + jnp.arange(KH)[None, :]
    iw = (jnp.arange(OW) * stride)[:, None] + jnp.arange(KW)[None, :]
    p = x[:, ih, :, :]                         # (N, OH, KH, W, C)
    p = p[:, :, :, iw, :]                      # (N, OH, KH, OW, KW, C)
    p = jnp.transpose(p, (0, 1, 3, 2, 4, 5))   # (N, OH, OW, KH, KW, C)
    return p.reshape(N * OH * OW, KH * KW * C), OH, OW


def conv2d_packed(x_padded, pk, KH, KW, stride):
    N = x_padded.shape[0]
    a, OH, OW = _im2col(x_padded, KH, KW, stride)
    out = gemm_bias_act(a, pk["w"], pk["b"], n_out=pk["n"], alpha=pk["alpha"])
    return out.reshape(N, OH, OW, pk["n"])


# ----------------------------------------------------------------------------
# Module-level building blocks (NHWC, bf16)
# ----------------------------------------------------------------------------
def conv_layer(x, pk, ksize, stride):
    """ConvLayer: reflection pad (k//2) + Conv2d(stride) [+ fused PReLU]."""
    pad = ksize // 2
    xp = jnp.pad(x, ((0, 0), (pad, pad), (pad, pad), (0, 0)), mode="reflect")
    return conv2d_packed(xp, pk, ksize, ksize, stride)


def conv_block(x, pk):
    """ConvBlock: Conv2d(k=4, s=2, p=1) + PReLU (fused in the GEMM)."""
    xp = jnp.pad(x, ((0, 0), (1, 1), (1, 1), (0, 0)))
    return conv2d_packed(xp, pk, 4, 4, 2)


def deconv_block(x, pk):
    """DeconvBlock: ConvTranspose2d(k=4, s=2, p=1) + PReLU as one sub-pixel
    GEMM (4 parity classes along GEMM N) followed by depth-to-space."""
    N, H, W, _ = x.shape
    oc = pk["oc"]
    xp = jnp.pad(x, ((0, 0), (1, 1), (1, 1), (0, 0)))
    a, _, _ = _im2col(xp, 3, 3, 1)             # windows = H x W
    out = gemm_bias_act(a, pk["w"], pk["b"], n_out=pk["n"], alpha=pk["alpha"])
    out = out.reshape(N, H, W, 2, 2, oc)       # (..., r, c, oc)
    return jnp.transpose(out, (0, 1, 3, 2, 4, 5)).reshape(N, 2 * H, 2 * W, oc)


def upsample_conv(x, pk):
    """UpsampleConvLayer: ConvTranspose2d(k=3, s=2, p=0), no activation, as a
    sub-pixel GEMM over 2x2 windows of the 1-padded input; depth-to-space to
    (2H+2, 2W+2), crop to the true (2H+1, 2W+1)."""
    N, H, W, _ = x.shape
    oc = pk["oc"]
    xp = jnp.pad(x, ((0, 0), (1, 1), (1, 1), (0, 0)))
    a, OH, OW = _im2col(xp, 2, 2, 1)           # OH = H+1, OW = W+1
    out = gemm_bias_act(a, pk["w"], pk["b"], n_out=pk["n"], alpha=None)
    out = out.reshape(N, OH, OW, 2, 2, oc)
    out = jnp.transpose(out, (0, 1, 3, 2, 4, 5)).reshape(N, 2 * OH, 2 * OW, oc)
    return out[:, : 2 * H + 1, : 2 * W + 1, :]


def residual_block(x, rb):
    out = conv_layer(x, rb["c1"], 3, 1)          # conv1 + fused PReLU
    out = conv_layer(out, rb["c2"], 3, 1) * 0.1  # conv2
    return out + x


def encoder_iter2(ft_l, ft_h_list, fp):
    num_ft = fp["num_ft"]
    ups, downs = fp["up"], fp["down"]
    ft_fusion = ft_l
    for i in range(len(ft_h_list)):
        ft = ft_fusion
        for j in range(num_ft - i):
            ft = deconv_block(ft, ups[j])
        ft = ft - ft_h_list[i]
        for j in range(num_ft - i):
            ft = conv_block(ft, downs[num_ft - i - j - 1])
        ft_fusion = ft_fusion + ft
    return ft_fusion


def decoder_iter2(ft_h, ft_l_list, fp):
    num_ft = fp["num_ft"]
    ups, downs = fp["up"], fp["down"]
    ft_fusion = ft_h
    for i in range(len(ft_l_list)):
        ft = ft_fusion
        for j in range(num_ft - i):
            ft = conv_block(ft, downs[j])
        ft = ft - ft_l_list[i]
        for j in range(num_ft - i):
            ft = deconv_block(ft, ups[num_ft - i - j - 1])
        ft_fusion = ft_fusion + ft
    return ft_fusion


def bilinear_resize(x, out_h, out_w):
    """F.upsample(..., mode='bilinear', align_corners=False) on NHWC."""
    N, H, W, C = x.shape
    if H == out_h and W == out_w:
        return x
    dtype = x.dtype
    xf = x.astype(jnp.float32)
    sy = (jnp.arange(out_h, dtype=jnp.float32) + 0.5) * (H / out_h) - 0.5
    sx = (jnp.arange(out_w, dtype=jnp.float32) + 0.5) * (W / out_w) - 0.5
    sy = jnp.clip(sy, 0.0, H - 1)
    sx = jnp.clip(sx, 0.0, W - 1)
    y0 = jnp.floor(sy).astype(jnp.int32)
    x0 = jnp.floor(sx).astype(jnp.int32)
    y1 = jnp.minimum(y0 + 1, H - 1)
    x1 = jnp.minimum(x0 + 1, W - 1)
    wy = (sy - y0.astype(jnp.float32))[None, :, None, None]
    wx = (sx - x0.astype(jnp.float32))[None, None, :, None]
    top = xf[:, y0, :, :]
    bot = xf[:, y1, :, :]
    row = top * (1.0 - wy) + bot * wy
    left = row[:, :, x0, :]
    right = row[:, :, x1, :]
    return (left * (1.0 - wx) + right * wx).astype(dtype)


# ----------------------------------------------------------------------------
# Deterministic parameter construction + GEMM weight packing (done once)
# ----------------------------------------------------------------------------
_BASE_KEY = jax.random.PRNGKey(0)
_COUNTER = [0]


def _next_key():
    _COUNTER[0] += 1
    return jax.random.fold_in(_BASE_KEY, _COUNTER[0])


def _rand_conv(oc, ic, kh, kw):
    std = 1.0 / math.sqrt(ic * kh * kw)
    w = jax.random.normal(_next_key(), (oc, ic, kh, kw), jnp.float32) * std
    b = jax.random.normal(_next_key(), (oc,), jnp.float32) * 0.01
    return w, b


def _rand_deconv(ic, oc, kh, kw):
    # torch.nn.ConvTranspose2d weight layout: (in_channels, out_channels, kH, kW)
    std = 1.0 / math.sqrt(ic * kh * kw)
    w = jax.random.normal(_next_key(), (ic, oc, kh, kw), jnp.float32) * std
    b = jax.random.normal(_next_key(), (oc,), jnp.float32) * 0.01
    return w, b


def _pack_gemm(w_mat, b_vec):
    """Pad K/N up to multiples of 128, W -> bf16, bias -> (1, N_pad) f32 row."""
    w_mat = np.asarray(w_mat, np.float32)
    b_vec = np.asarray(b_vec, np.float32)
    K, N = w_mat.shape
    Kp, Np = _round_up(K, 128), _round_up(N, 128)
    wp = np.zeros((Kp, Np), np.float32)
    wp[:K, :N] = w_mat
    bp = np.zeros((1, Np), np.float32)
    bp[0, :N] = b_vec
    return {"w": jnp.asarray(wp, jnp.bfloat16), "b": jnp.asarray(bp, jnp.float32),
            "n": N, "alpha": None}


def _pack_conv(w, b, k, alpha=None):
    """torch Conv2d weight (oc, ic, kh, kw) -> (k*k*ic, oc) in (kh, kw, ic) order."""
    w = np.asarray(w, np.float32)
    oc, ic = w.shape[0], w.shape[1]
    wm = np.transpose(w, (2, 3, 1, 0)).reshape(k * k * ic, oc)
    pk = _pack_gemm(wm, b)
    pk["alpha"] = alpha
    return pk


def _pack_deconv4_subpixel(w, b, alpha=0.25):
    """ConvTranspose2d(k=4, s=2, p=1) weight (ic, oc, 4, 4) -> sub-pixel GEMM:
    3x3 window over the 1-padded input -> 4*oc outputs (one oc group per
    output parity class)."""
    w = np.asarray(w, np.float32)
    b = np.asarray(b, np.float32)
    ic, oc = w.shape[0], w.shape[1]
    Wc = np.zeros((3, 3, ic, 4, oc), np.float32)
    # parity r/c -> {window tap index: transposed-conv kernel tap}
    tap_map = {0: {0: 3, 1: 1}, 1: {1: 2, 2: 0}}
    for r in (0, 1):
        for c in (0, 1):
            cls = r * 2 + c
            for th, kh in tap_map[r].items():
                for tw, kw in tap_map[c].items():
                    Wc[th, tw, :, cls, :] = w[:, :, kh, kw]
    pk = _pack_gemm(Wc.reshape(9 * ic, 4 * oc), np.tile(b, 4))
    pk["alpha"] = alpha
    pk["oc"] = oc
    return pk


def _pack_upsample3_subpixel(w, b):
    """ConvTranspose2d(k=3, s=2, p=0) weight (ic, oc, 3, 3) -> sub-pixel GEMM:
    2x2 window over the 1-padded input -> 4*oc outputs (parity classes)."""
    w = np.asarray(w, np.float32)
    b = np.asarray(b, np.float32)
    ic, oc = w.shape[0], w.shape[1]
    Wc = np.zeros((2, 2, ic, 4, oc), np.float32)
    tap_map = {0: {0: 2, 1: 0}, 1: {1: 1}}
    for r in (0, 1):
        for c in (0, 1):
            cls = r * 2 + c
            for th, kh in tap_map[r].items():
                for tw, kw in tap_map[c].items():
                    Wc[th, tw, :, cls, :] = w[:, :, kh, kw]
    pk = _pack_gemm(Wc.reshape(4 * ic, 4 * oc), np.tile(b, 4))
    pk["alpha"] = None
    pk["oc"] = oc
    return pk


def init_convlayer(ic, oc, k, alpha=None):
    w, b = _rand_conv(oc, ic, k, k)
    return _pack_conv(w, b, k, alpha)


def init_convblock(ic, oc, alpha=0.25):
    w, b = _rand_conv(oc, ic, 4, 4)
    return _pack_conv(w, b, 4, alpha)


def init_deconvblock(ic, oc, alpha=0.25):
    w, b = _rand_deconv(ic, oc, 4, 4)
    return _pack_deconv4_subpixel(w, b, alpha)


def init_upsample(ic, oc):
    w, b = _rand_deconv(ic, oc, 3, 3)
    return _pack_upsample3_subpixel(w, b)


def init_rb(ch):
    return {"c1": init_convlayer(ch, ch, 3, alpha=0.25),
            "c2": init_convlayer(ch, ch, 3, alpha=None)}


def init_encoder(num_filter, num_ft):
    n = num_ft - 1
    ups, downs = [], []
    for i in range(n):
        ups.append(init_deconvblock(num_filter // 2 ** i, num_filter // 2 ** (i + 1)))
        downs.append(init_convblock(num_filter // 2 ** (i + 1), num_filter // 2 ** i))
    return {"num_ft": n, "up": ups, "down": downs}


def init_decoder(num_filter, num_ft):
    n = num_ft - 1
    ups, downs = [], []
    for i in range(n):
        downs.append(init_convblock(num_filter * 2 ** i, num_filter * 2 ** (i + 1)))
        ups.append(init_deconvblock(num_filter * 2 ** (i + 1), num_filter * 2 ** i))
    return {"num_ft": n, "up": ups, "down": downs}


def init_net(res_blocks=18):
    p = {}
    p["conv_input"] = init_convlayer(3, 16, 11)
    p["dense0"] = [init_rb(16) for _ in range(3)]
    p["conv2x"] = init_convlayer(16, 32, 3)
    p["fusion1"] = init_encoder(32, 2)
    p["dense1"] = [init_rb(32) for _ in range(3)]
    p["conv4x"] = init_convlayer(32, 64, 3)
    p["fusion2"] = init_encoder(64, 3)
    p["dense2"] = [init_rb(64) for _ in range(3)]
    p["conv8x"] = init_convlayer(64, 128, 3)
    p["fusion3"] = init_encoder(128, 4)
    p["dense3"] = [init_rb(128) for _ in range(3)]
    p["conv16x"] = init_convlayer(128, 256, 3)
    p["fusion4"] = init_encoder(256, 5)
    p["dehaze"] = [init_rb(256) for _ in range(res_blocks)]
    p["convd16x"] = init_upsample(256, 128)
    p["dense_4"] = [init_rb(128) for _ in range(3)]
    p["fusion_4"] = init_decoder(128, 2)
    p["convd8x"] = init_upsample(128, 64)
    p["dense_3"] = [init_rb(64) for _ in range(3)]
    p["fusion_3"] = init_decoder(64, 3)
    p["convd4x"] = init_upsample(64, 32)
    p["dense_2"] = [init_rb(32) for _ in range(3)]
    p["fusion_2"] = init_decoder(32, 4)
    p["convd2x"] = init_upsample(32, 16)
    p["dense_1"] = [init_rb(16) for _ in range(3)]
    p["fusion_1"] = init_decoder(16, 5)
    p["conv_output"] = init_convlayer(16, 3, 3)
    return p


# ----------------------------------------------------------------------------
# Net.forward (NCHW in/out to match the PyTorch interface; bf16 internally)
# ----------------------------------------------------------------------------
def net_forward(x_nchw, p):
    x = jnp.transpose(x_nchw, (0, 2, 3, 1)).astype(jnp.bfloat16)  # NHWC bf16

    res1x = conv_layer(x, p["conv_input"], 11, 1)
    feature_mem = [res1x]
    d = res1x
    for rb in p["dense0"]:
        d = residual_block(d, rb)
    x = d + res1x

    res2x = conv_layer(x, p["conv2x"], 3, 2)
    res2x = encoder_iter2(res2x, feature_mem, p["fusion1"])
    feature_mem.append(res2x)
    d = res2x
    for rb in p["dense1"]:
        d = residual_block(d, rb)
    res2x = d + res2x

    res4x = conv_layer(res2x, p["conv4x"], 3, 2)
    res4x = encoder_iter2(res4x, feature_mem, p["fusion2"])
    feature_mem.append(res4x)
    d = res4x
    for rb in p["dense2"]:
        d = residual_block(d, rb)
    res4x = d + res4x

    res8x = conv_layer(res4x, p["conv8x"], 3, 2)
    res8x = encoder_iter2(res8x, feature_mem, p["fusion3"])
    feature_mem.append(res8x)
    d = res8x
    for rb in p["dense3"]:
        d = residual_block(d, rb)
    res8x = d + res8x

    res16x = conv_layer(res8x, p["conv16x"], 3, 2)
    res16x = encoder_iter2(res16x, feature_mem, p["fusion4"])

    res_dehaze = res16x
    in_ft = res16x * 2.0
    d = in_ft
    for rb in p["dehaze"]:
        d = residual_block(d, rb)
    res16x = d + in_ft - res_dehaze

    feature_mem_up = [res16x]
    res16x = upsample_conv(res16x, p["convd16x"])
    res16x = bilinear_resize(res16x, res8x.shape[1], res8x.shape[2])
    res8x = res16x + res8x
    d = res8x
    for rb in p["dense_4"]:
        d = residual_block(d, rb)
    res8x = d + res8x - res16x
    res8x = decoder_iter2(res8x, feature_mem_up, p["fusion_4"])
    feature_mem_up.append(res8x)

    res8x = upsample_conv(res8x, p["convd8x"])
    res8x = bilinear_resize(res8x, res4x.shape[1], res4x.shape[2])
    res4x = res8x + res4x
    d = res4x
    for rb in p["dense_3"]:
        d = residual_block(d, rb)
    res4x = d + res4x - res8x
    res4x = decoder_iter2(res4x, feature_mem_up, p["fusion_3"])
    feature_mem_up.append(res4x)

    res4x = upsample_conv(res4x, p["convd4x"])
    res4x = bilinear_resize(res4x, res2x.shape[1], res2x.shape[2])
    res2x = res4x + res2x
    d = res2x
    for rb in p["dense_2"]:
        d = residual_block(d, rb)
    res2x = d + res2x - res4x
    res2x = decoder_iter2(res2x, feature_mem_up, p["fusion_2"])
    feature_mem_up.append(res2x)

    res2x = upsample_conv(res2x, p["convd2x"])
    res2x = bilinear_resize(res2x, x.shape[1], x.shape[2])
    x = res2x + x
    d = x
    for rb in p["dense_1"]:
        d = residual_block(d, rb)
    x = d + x - res2x
    x = decoder_iter2(x, feature_mem_up, p["fusion_1"])
    x = conv_layer(x, p["conv_output"], 3, 1)

    return jnp.transpose(x, (0, 3, 1, 2)).astype(jnp.float32)  # NCHW f32


# ----------------------------------------------------------------------------
# XLA reference convs (used only for self-checks in __main__)
# ----------------------------------------------------------------------------
def _ref_conv2d(x, w, b, stride):
    """x: NHWC (already padded), w: (oc, ic, kh, kw) torch layout, valid conv."""
    wk = jnp.transpose(w, (2, 3, 1, 0))  # HWIO
    y = jax.lax.conv_general_dilated(
        x, wk, (stride, stride), "VALID",
        dimension_numbers=("NHWC", "HWIO", "NHWC"))
    return y + b


def _ref_conv_transpose(x, w, b, stride, pad):
    """x: NHWC, w: (ic, oc, kh, kw) torch ConvTranspose2d layout."""
    k = w.shape[2]
    wk = jnp.transpose(w[:, :, ::-1, ::-1], (2, 3, 0, 1))  # flip -> HWIO
    y = jax.lax.conv_general_dilated(
        x, wk, (1, 1), [(k - 1 - pad, k - 1 - pad)] * 2,
        lhs_dilation=(stride, stride),
        dimension_numbers=("NHWC", "HWIO", "NHWC"))
    return y + b


# ----------------------------------------------------------------------------
if __name__ == "__main__":
    # --- building-block self-checks (Pallas GEMM path vs XLA conv reference) ---
    def _chk(name, got, ref, tol=5e-2):
        err = float(jnp.max(jnp.abs(got.astype(jnp.float32) - ref)))
        assert err < tol, f"{name} mismatch: max abs err {err}"

    cic, coc = 8, 8
    xt = jax.random.normal(jax.random.PRNGKey(101), (1, 6, 7, cic), jnp.float32)
    xt16 = xt.astype(jnp.bfloat16)
    xt_r = xt16.astype(jnp.float32)

    # ConvLayer: reflect pad + 3x3 conv (covers im2col order + GEMM + bias)
    wc, bc = _rand_conv(coc, cic, 3, 3)
    got = conv_layer(xt16, _pack_conv(wc, bc, 3, alpha=None), 3, 1)
    ref = _ref_conv2d(jnp.pad(xt_r, ((0, 0), (1, 1), (1, 1), (0, 0)), mode="reflect"),
                      jnp.asarray(wc, jnp.bfloat16).astype(jnp.float32), bc, 1)
    _chk("conv_layer", got, ref)

    # DeconvBlock: ConvTranspose2d(k=4, s=2, p=1) + PReLU via sub-pixel GEMM
    wd, bd = _rand_deconv(cic, coc, 4, 4)
    got = deconv_block(xt16, _pack_deconv4_subpixel(wd, bd, alpha=0.25))
    ref = _ref_conv_transpose(xt_r, jnp.asarray(wd, jnp.bfloat16).astype(jnp.float32),
                              bd, 2, 1)
    ref = jnp.where(ref >= 0.0, ref, 0.25 * ref)
    _chk("deconv_block", got, ref)

    # UpsampleConvLayer: ConvTranspose2d(k=3, s=2, p=0) via sub-pixel GEMM
    wu, bu = _rand_deconv(cic, coc, 3, 3)
    got = upsample_conv(xt16, _pack_upsample3_subpixel(wu, bu))
    ref = _ref_conv_transpose(xt_r, jnp.asarray(wu, jnp.bfloat16).astype(jnp.float32),
                              bu, 2, 0)
    _chk("upsample_conv", got, ref)

    # --- full network forward ---
    # Spatial size must be >= 32 so the /16 feature map is >= 2x2
    # (ReflectionPad2d(1) in the dehaze residual blocks requires dim > pad).
    params = init_net(res_blocks=18)
    x_in = jax.random.normal(jax.random.PRNGKey(0), (1, 3, 32, 32), jnp.float32)
    out = net_forward(x_in, params)
    out = jax.block_until_ready(out)
    assert out.shape == (1, 3, 32, 32), out.shape
    assert bool(jnp.all(jnp.isfinite(out)))
    print("KERNEL_OK")
</pallas_src>

<mosaic_0001>
module attributes {stable_mosaic.version = 11 : i64} {
  func.func @_gemm_bias_act_kernel(%arg0: i32, %arg1: memref<48x128xbf16, #tpu.memory_space<vmem>>, %arg2: memref<128x128xbf16, #tpu.memory_space<vmem>>, %arg3: memref<1x128xf32, #tpu.memory_space<vmem>>, %arg4: memref<48x128xbf16, #tpu.memory_space<vmem>>) attributes {dimension_semantics = [#tpu.dimension_semantics<parallel>], iteration_bounds = array<i64: 1>, scalar_prefetch = 0 : i64, scratch_operands = 0 : i64, tpu.core_type = #tpu.core_type<tc>, window_params = [{transform_indices = @transform_0, window_bounds = array<i64: 48, 128>}, {pipeline_mode = #tpu.pipeline_mode<synchronous>, transform_indices = @transform_1, window_bounds = array<i64: 128, 128>}, {pipeline_mode = #tpu.pipeline_mode<synchronous>, transform_indices = @transform_2, window_bounds = array<i64: 1, 128>}, {transform_indices = @transform_3, window_bounds = array<i64: 48, 128>}]} {
    %c0 = arith.constant 0 : index
    %c0_0 = arith.constant 0 : index
    %0 = vector.load %arg1[%c0, %c0_0] : memref<48x128xbf16, #tpu.memory_space<vmem>>, vector<48x128xbf16>
    %c0_1 = arith.constant 0 : index
    %c0_2 = arith.constant 0 : index
    %1 = vector.load %arg2[%c0_1, %c0_2] : memref<128x128xbf16, #tpu.memory_space<vmem>>, vector<128x128xbf16>
    %cst = arith.constant dense<0.000000e+00> : vector<48x128xf32>
    %2 = tpu.matmul %0, %1, %cst {dimension_numbers = #tpu.dot_dimension_numbers<[1], [0], [0], [1], [0, 0, 1, 1], [], []>} : vector<48x128xbf16>, vector<128x128xbf16>, vector<48x128xf32> -> vector<48x128xf32>
    %c0_3 = arith.constant 0 : index
    %c0_4 = arith.constant 0 : index
    %3 = vector.load %arg3[%c0_3, %c0_4] : memref<1x128xf32, #tpu.memory_space<vmem>>, vector<1x128xf32>
    %4 = vector.broadcast %3 : vector<1x128xf32> to vector<48x128xf32>
    %5 = arith.addf %2, %4 : vector<48x128xf32>
    %6 = arith.truncf %5 : vector<48x128xf32> to vector<48x128xbf16>
    %c0_5 = arith.constant 0 : index
    %c0_6 = arith.constant 0 : index
    %7 = vector.load %arg4[%c0_5, %c0_6] : memref<48x128xbf16, #tpu.memory_space<vmem>>, vector<48x128xbf16>
    tpu.vector_store %arg4[%c0_5, %c0_6], %6 {strides = array<i32>} : memref<48x128xbf16, #tpu.memory_space<vmem>>, vector<48x128xbf16>,
    return
  }
  func.func @transform_0(%arg0: i32) -> (i32, i32) {
    %c0_i32 = arith.constant 0 : i32
    %c0_i32_0 = arith.constant 0 : i32
    return %arg0, %c0_i32 : i32, i32
  }
  func.func @transform_1(%arg0: i32) -> (i32, i32) {
    %c0_i32 = arith.constant 0 : i32
    %c0_i32_0 = arith.constant 0 : i32
    %c0_i32_1 = arith.constant 0 : i32
    return %c0_i32, %c0_i32_0 : i32, i32
  }
  func.func @transform_2(%arg0: i32) -> (i32, i32) {
    %c0_i32 = arith.constant 0 : i32
    %c0_i32_0 = arith.constant 0 : i32
    %c0_i32_1 = arith.constant 0 : i32
    return %c0_i32, %c0_i32_0 : i32, i32
  }
  func.func @transform_3(%arg0: i32) -> (i32, i32) {
    %c0_i32 = arith.constant 0 : i32
    %c0_i32_0 = arith.constant 0 : i32
    return %arg0, %c0_i32 : i32, i32
  }
}

</mosaic_0001>

<bundles_post_ra>
// kernel: gemm_bias_act.1
= control target key start
LH: loop header
LB: loop body
LE: loop exit
PB: predicated region body
PF: predicated region fallthrough
CT: control target
= control target key end

     0   :  { %8 = vsyncpa [#allocation3], 0  ;;  %s281_s15 = smov [#allocation2]   ;;  %s282_s17 = smov 64   ;;  %s328_s0 = inlined_call_operand.vmem [shape: bf16[48,128], index: 0, kind: input, shape index: {}]   ;;  %s329_s1 = inlined_call_operand.hbm [shape: bf16[128,128], index: 1, kind: input, shape index: {}]   ;;  %s330_s2 = inlined_call_operand.vmem [shape: f32[1,128], index: 2, kind: input, shape index: {}]   ;;  %s331_s3 = inlined_call_operand.vmem [shape: bf16[48,128], index: 3, kind: output, shape index: {}]  }
   0x1   :  { %s15_s14 = sshll.u32 %s329_s1, 4  ;;  %s17_s16 = sshll.u32 %s281_s15, 4  ;;  %s16_s14 = int_to_ptr.hbm [resolvable:$true] %s15_s14  ;;  %s18_s16 = int_to_ptr.vmem [resolvable:$true] %s17_s16 }
   0x2   :  { %s283_s18 = smov 4  }
   0x3   :  { %23 = dma.hbm_to_vmem [thread:$0]  %s16_s14, 1024, %s18_s16, [#allocation3], %s282_s17, %s282_s17, %s283_s18  }
   0x4   :  { %279 = dma.done.wait [#allocation3], 1024  }
   0x5   :  { %280 = vsyncadd [#allocation3], 4294966272  ;;  %v217_v0 = vld [vmem:[#allocation2 + $0x38] sm:$0xff]  ;;  %v216_v1 = vld [vmem:[#allocation2 + $0x30] sm:$0xff] }
   0x6   :  { %122 = vmatpush.bf16.msra.mxu0 %v217_v0  ;;  %235 = vmatpush.bf16.msra.mxu1 %v217_v0  ;;  %v215_v2 = vld [vmem:[#allocation2 + $0x28] sm:$0xff]  ;;  %v214_v3 = vld [vmem:[#allocation2 + $0x20] sm:$0xff]  ;;  %v213_v4 = vld [vmem:[#allocation2 + $0x18] sm:$0xff] }
   0x7   :  { %236 = vmatpush.bf16.msra.mxu2 %v217_v0  ;;  %v212_v5 = vld [vmem:[#allocation2 + $0x10] sm:$0xff]  ;;  %v211_v6 = vld [vmem:[#allocation2 + $0x8] sm:$0xff]  ;;  %v210_v7 = vld [vmem:[#allocation2] sm:$0xff] }
   0x8   :  { %v207_v8 = vld [vmem:[%s328_s0] sm:$0xff]  ;;  %v208_v9 = vld [vmem:[%s328_s0 + $0x8] sm:$0xff]  ;;  %v209_v10 = vld [vmem:[%s328_s0 + $0x10] sm:$0xff] }
   0x9   :  { %v254_v13 = vld [vmem:[%s330_s2] ss:$0 sm:$0xff] }
   0xa   :  { %123 = vmatpush.bf16.msra.mxu0 %v216_v1  ;;  %237 = vmatpush.bf16.msra.mxu1 %v216_v1 }
   0xb   :  { %238 = vmatpush.bf16.msra.mxu2 %v216_v1 }
   0xe   :  { %124 = vmatpush.bf16.msra.mxu0 %v215_v2  ;;  %239 = vmatpush.bf16.msra.mxu1 %v215_v2 }
   0xf   :  { %240 = vmatpush.bf16.msra.mxu2 %v215_v2 }
  0x12   :  { %125 = vmatpush.bf16.msra.mxu0 %v214_v3  ;;  %241 = vmatpush.bf16.msra.mxu1 %v214_v3 }
  0x13   :  { %242 = vmatpush.bf16.msra.mxu2 %v214_v3 }
  0x16   :  { %126 = vmatpush.bf16.msra.mxu0 %v213_v4  ;;  %243 = vmatpush.bf16.msra.mxu1 %v213_v4 }
  0x17   :  { %244 = vmatpush.bf16.msra.mxu2 %v213_v4 }
  0x1a   :  { %127 = vmatpush.bf16.msra.mxu0 %v212_v5  ;;  %245 = vmatpush.bf16.msra.mxu1 %v212_v5 }
  0x1b   :  { %246 = vmatpush.bf16.msra.mxu2 %v212_v5 }
  0x1e   :  { %128 = vmatpush.bf16.msra.mxu0 %v211_v6  ;;  %247 = vmatpush.bf16.msra.mxu1 %v211_v6 }
  0x1f   :  { %248 = vmatpush.bf16.msra.mxu2 %v211_v6 }
  0x22   :  { %129 = vmatpush.bf16.msra.mxu0 %v210_v7  ;;  %249 = vmatpush.bf16.msra.mxu1 %v210_v7 }
  0x23   :  { %250 = vmatpush.bf16.msra.mxu2 %v210_v7 }
  0x25   :  { %130 = vmatmul.bf16.vlgmr.msra.gmra.mxu0 %v207_v8  ;;  %135 = vmatmul.bf16.vlgmr.msra.gmra.mxu1 %v208_v9 }
  0x26   :  { %140 = vmatmul.bf16.vlgmr.msra.gmra.mxu2 %v209_v10 }
  0xa2   :  { %v131_v11 = vpop.f32.mrf.mxu0  ;;  %v136_v12 = vpop.f32.mrf.mxu1 }
  0xa3   :  { %v132_v17 = vadd.f32 %v254_v13, %v131_v11  ;;  %v137_v18 = vadd.f32 %v254_v13, %v136_v12 }
  0xa9   :  { %v141_v14 = vpop.f32.mrf.mxu2 }
  0xaa   :  { %v133_v15 = vpop.f32.mrf.mxu0  ;;  %v138_v16 = vpop.f32.mrf.mxu1  ;;  %v142_v24 = vadd.f32 %v254_v13, %v141_v14 }
  0xab   :  { %v134_v19 = vadd.f32 %v254_v13, %v133_v15  ;;  %v139_v20 = vadd.f32 %v254_v13, %v138_v16 }
  0xad   :  { %v221_v21 = vpack.c.bf16 %v134_v19, %v132_v17  ;;  %v226_v22 = vpack.c.bf16 %v139_v20, %v137_v18 }
  0xaf   :  { %222 = vst [vmem:[%s331_s3] sm:$0xff] %v221_v21  }
  0xb0   :  { %233 = vst [vmem:[%s331_s3 + $0x8] sm:$0xff] %v226_v22  }
  0xb1   :  { %v143_v23 = vpop.f32.mrf.mxu2 }
  0xb2   :  { %v144_v25 = vadd.f32 %v254_v13, %v143_v23 }
  0xb4   :  { %v231_v26 = vpack.c.bf16 %v144_v25, %v142_v24 }
  0xb6   :  { %234 = vst [vmem:[%s331_s3 + $0x10] sm:$0xff] %v231_v26  }
  0xb7   :  { %162 = vsyncpa [#allocation3], 1 }

</bundles_post_ra>
